<compile_context>
chip_gen: v6e
topology: v6e:2x2x1
jax: 0.10.0
libtpu: 0.0.40
codegen_flags: <defaults>
</compile_context>

<pallas_src>
import functools

import jax
import jax.numpy as jnp
from jax import lax
from jax.experimental import pallas as pl
from jax.experimental.pallas import tpu as pltpu

_LANE = 128
_MAX_TILE_M = 2048
_NEG_BIG = -1e30  # finite "minus infinity": avoids inf-inf -> NaN in carries


def _cdiv(a, b):
    return -(-a // b)


def _round_up(a, b):
    return _cdiv(a, b) * b


def _cwd_kernel(t_ref, s_ref, o_ref, m_t, z_t, a_ts, m_s, z_s,
                *, inv_tau, num_rows, num_lanes, tile_m, tile_l):
    """One (row-tile, lane-chunk) step of
         sum_rows sum_L softmax(t) * (logsoftmax(t) - logsoftmax(s)).

    Per-row carries (running max / sum-exp for teacher & student, plus the
    cross term A = sum_L exp(t - m_t) * (t - s)) live in VMEM scratch; the
    per-row cost is   A/Z_t + (m_s - m_t) + log Z_s - log Z_t.
    The tile's partial sum is written into element [0,0,0] of a lane-dense
    (1, 8, 128) output block on the last lane chunk.
    """
    i = pl.program_id(0)          # row tile
    l = pl.program_id(1)          # lane chunk
    n_l = pl.num_programs(1)

    @pl.when(l == 0)
    def _():
        m_t[...] = jnp.full_like(m_t, _NEG_BIG)
        m_s[...] = jnp.full_like(m_s, _NEG_BIG)
        z_t[...] = jnp.zeros_like(z_t)
        z_s[...] = jnp.zeros_like(z_s)
        a_ts[...] = jnp.zeros_like(a_ts)

    t = t_ref[...].astype(jnp.float32)
    s = s_ref[...].astype(jnp.float32)
    if inv_tau != 1.0:            # baked Python float: elided when tau == 1.0
        t = t * inv_tau
        s = s * inv_tau

    # Lane-tail masking (compile-time elided when tile_l divides L).  Masking
    # to a large negative finite value makes exp() exactly 0 while keeping all
    # arithmetic finite, so undefined out-of-bounds data cannot leak NaN/Inf.
    if num_lanes % tile_l != 0:
        lidx = l * tile_l + lax.broadcasted_iota(jnp.int32, (tile_m, tile_l), 1)
        valid = lidx < num_lanes
        t = jnp.where(valid, t, _NEG_BIG)
        s = jnp.where(valid, s, _NEG_BIG)

    diff = t - s

    # TODO(synk): if a v7x bundle dump shows the VALU slot saturating, the
    # three lane-axis accumulations below could be offloaded to the idle MXU
    # via a matmul against a ones(L, 128) operand.

    # Teacher: online log-sum-exp + cross term (reduce over lanes first; the
    # per-row normalization never gets broadcast back over the lane axis).
    mt_new = jnp.maximum(m_t[...], jnp.max(t, axis=-1, keepdims=True))
    alpha_t = jnp.exp(m_t[...] - mt_new)
    e_t = jnp.exp(t - mt_new)
    z_t[...] = alpha_t * z_t[...] + jnp.sum(e_t, axis=-1, keepdims=True)
    a_ts[...] = alpha_t * a_ts[...] + jnp.sum(e_t * diff, axis=-1, keepdims=True)
    m_t[...] = mt_new

    # Student: online log-sum-exp only.
    ms_new = jnp.maximum(m_s[...], jnp.max(s, axis=-1, keepdims=True))
    z_s[...] = (jnp.exp(m_s[...] - ms_new) * z_s[...]
                + jnp.sum(jnp.exp(s - ms_new), axis=-1, keepdims=True))
    m_s[...] = ms_new

    @pl.when(l == n_l - 1)
    def _():
        row = (a_ts[...] * pl.reciprocal(z_t[...], approx=False)
               + (m_s[...] - m_t[...])
               + jnp.log(z_s[...]) - jnp.log(z_t[...]))          # (tile_m, 1)
        # Row-tail masking: select at the per-row level so NaN/Inf from
        # undefined padded rows never reaches the sum.
        if num_rows % tile_m != 0:
            ridx = i * tile_m + lax.broadcasted_iota(jnp.int32, (tile_m, 1), 0)
            row = jnp.where(ridx < num_rows, row, 0.0)
        part = jnp.sum(row)                                      # scalar

        # Lane-dense partial-sum block: value at [0,0,0], zeros elsewhere, so
        # the HBM writeback is a full, unmasked (8,128) store.
        pos = (lax.broadcasted_iota(jnp.int32, (1, 8, 128), 1) * 128
               + lax.broadcasted_iota(jnp.int32, (1, 8, 128), 2))
        o_ref[...] = jnp.where(pos == 0, part, 0.0).astype(jnp.float32)


def _vmem_limit_bytes():
    """Scoped-VMEM limit for this kernel, derived from the chip's capacity."""
    try:
        cap = int(pltpu.get_tpu_info().vmem_capacity_bytes)
    except Exception:
        cap = 64 * 1024 * 1024  # conservative fallback (v7x per-core VMEM)
    return min(int(cap) * 3 // 4, 96 * 1024 * 1024)


def _pick_tiles(M, L, itemsize, vmem_limit):
    """(tile_m, tile_l) such that the pipelined working set fits in VMEM.

    Per (row, lane) element the kernel needs:
      * 2 inputs x 2 pipeline buffers at the input dtype, and
      * ~4 full-tile f32 intermediates Mosaic materializes (f32 upcasts of
        bf16 inputs, exp(), shifted differences).
    bf16 inputs therefore roughly halve the streamed bytes AND shrink the
    input-buffer footprint, which is what restores large tiles on v7x's
    64 MiB VMEM.
    """
    per_elem = 4 * itemsize + 4 * 4
    budget = int(vmem_limit * 0.7)           # explicit headroom for the rest
    m_pad8 = _round_up(M, 8)

    # Full-row (un-chunked L) tiles.
    tm_full = min((budget // (per_elem * L)) // 8 * 8, _MAX_TILE_M, m_pad8)
    if L <= 1024 or tm_full >= min(m_pad8, 256):
        return max(8, tm_full), L

    # Large L: chunk the lane axis (flash-style carries) so the row tile stays
    # reasonably big and huge feature maps can never blow the scoped limit.
    tile_m = min(256, m_pad8)
    tile_l = max(4 * _LANE, (budget // (per_elem * tile_m)) // _LANE * _LANE)
    tile_l = min(tile_l, _round_up(L, _LANE))
    return tile_m, tile_l


def _balance_row_tiles(M, tile_m):
    """Shrink tile_m (keeping a multiple of 8) so the row-tile count is even.

    The row axis is "parallel": on v7x it is sharded across 2 TensorCores, and
    an odd tile count leaves one core with up to 2x the work.  On single-TC
    chips the extra grid step costs ~0.35 us - negligible.
    """
    n = _cdiv(M, tile_m)
    if n <= 1 or n % 2 == 0:
        return tile_m
    t = tile_m - 8
    while t >= 8:
        if _cdiv(M, t) % 2 == 0:
            return t
        t -= 8
    return tile_m


def _cwd_stage_sum(t2d, s2d, tau, tile_override=None):
    """sum( softmax(t/tau) * (logsoftmax(t/tau) - logsoftmax(s/tau)) ) over (M, L)."""
    M, L = t2d.shape
    vmem_limit = _vmem_limit_bytes()
    if tile_override is None:
        tile_m, tile_l = _pick_tiles(M, L, jnp.dtype(t2d.dtype).itemsize,
                                     vmem_limit)
        tile_m = _balance_row_tiles(M, tile_m)
    else:
        tile_m, tile_l = tile_override

    num_row_tiles = _cdiv(M, tile_m)
    num_l_chunks = _cdiv(L, tile_l)

    kernel = functools.partial(
        _cwd_kernel, inv_tau=1.0 / tau, num_rows=M, num_lanes=L,
        tile_m=tile_m, tile_l=tile_l)

    partials = pl.pallas_call(
        kernel,
        out_shape=jax.ShapeDtypeStruct((num_row_tiles, 8, 128), jnp.float32),
        grid_spec=pltpu.PrefetchScalarGridSpec(
            num_scalar_prefetch=0,
            grid=(num_row_tiles, num_l_chunks),
            in_specs=[
                pl.BlockSpec((tile_m, tile_l), lambda i, l: (i, l)),
                pl.BlockSpec((tile_m, tile_l), lambda i, l: (i, l)),
            ],
            out_specs=pl.BlockSpec((1, 8, 128), lambda i, l: (i, 0, 0)),
            scratch_shapes=[pltpu.VMEM((tile_m, 1), jnp.float32)] * 5,
        ),
        compiler_params=pltpu.CompilerParams(
            dimension_semantics=("parallel", "arbitrary"),
            vmem_limit_bytes=vmem_limit,
        ),
    )(t2d, s2d)
    return jnp.sum(partials)


def _stage_sum_ref(t2d, s2d, tau):
    """Plain-XLA per-stage sum (also the fallback path for tiny feature maps)."""
    t = t2d.astype(jnp.float32) / tau
    s = s2d.astype(jnp.float32) / tau
    p_t = jax.nn.softmax(t, axis=1)
    return jnp.sum(p_t * (jax.nn.log_softmax(t, axis=1)
                          - jax.nn.log_softmax(s, axis=1)))


def cwd_loss(y_s, y_t, tau=1.0):
    """Channel-wise distillation loss over a list of NCHW stages.

    Matches the PyTorch reference:
      cost = sum( softmax(t/tau) * (logsoftmax(t/tau) - logsoftmax(s/tau)) ) * tau^2
      loss = sum_over_stages( cost / (C * N) )
    Inputs may be bf16 (halves HBM traffic and VMEM input footprint); the
    kernel computes in f32.
    """
    assert len(y_s) == len(y_t)
    # TODO(synk): stages sharing the same H*W could be fused into one
    # pallas_call with a per-row weight tau^2/(C*N), but concatenating rows
    # costs an extra full HBM pass on this mem-bound kernel; only worthwhile
    # when many stages share L (small stages already take the XLA path below).
    total = jnp.float32(0.0)
    for s, t in zip(y_s, y_t):
        assert s.shape == t.shape
        N, C, H, W = s.shape
        M, L = N * C, H * W
        t2d = t.reshape(M, L)
        s2d = s.reshape(M, L)
        if L < 128:
            # Lane-sparse and launch-overhead dominated: plain XLA is faster.
            cost = _stage_sum_ref(t2d, s2d, float(tau))
        else:
            cost = _cwd_stage_sum(t2d, s2d, float(tau))
        total = total + cost * (float(tau) ** 2) / (C * N)
    return total


def _reference(y_s, y_t, tau=1.0):
    """Pure-JAX reference for correctness checking."""
    total = jnp.float32(0.0)
    for s, t in zip(y_s, y_t):
        N, C, H, W = s.shape
        total = total + (_stage_sum_ref(t.reshape(-1, H * W),
                                        s.reshape(-1, H * W), tau)
                         * (tau ** 2) / (C * N))
    return total


if __name__ == "__main__":
    key = jax.random.PRNGKey(0)
    ks = jax.random.split(key, 8)

    # Three stages, NCHW.  Stage 2 has N*C = 10 (not a multiple of 8) to
    # exercise in-kernel row-tail masking; stage 3 has H*W = 64 < 128 and
    # takes the plain-XLA fallback path.
    shapes = [(2, 4, 16, 16), (2, 5, 16, 16), (2, 8, 8, 8)]
    y_s = [jax.random.normal(ks[i], shp, dtype=jnp.float32)
           for i, shp in enumerate(shapes)]
    y_t = [jax.random.normal(ks[3 + i], shp, dtype=jnp.float32)
           for i, shp in enumerate(shapes)]

    tau = 1.0
    loss = jax.block_until_ready(cwd_loss(y_s, y_t, tau=tau))
    ref = _reference(y_s, y_t, tau=tau)
    assert jnp.allclose(loss, ref, rtol=1e-4, atol=1e-4), (loss, ref)

    # Explicitly exercise the L-chunked (online log-sum-exp) path with both a
    # lane tail and a row tail, plus tau != 1, by forcing (tile_m=8, tile_l=128)
    # on a small stage: M = 6 rows, L = 320 lanes -> 3 chunks, last one masked.
    shp = (2, 3, 16, 20)
    st = jax.random.normal(ks[6], shp, dtype=jnp.float32)
    tt = jax.random.normal(ks[7], shp, dtype=jnp.float32)
    M, L = shp[0] * shp[1], shp[2] * shp[3]
    chunked = jax.block_until_ready(
        _cwd_stage_sum(tt.reshape(M, L), st.reshape(M, L), 2.0,
                       tile_override=(8, 128)))
    chunked_ref = _stage_sum_ref(tt.reshape(M, L), st.reshape(M, L), 2.0)
    assert jnp.allclose(chunked, chunked_ref, rtol=1e-4, atol=1e-4), (
        chunked, chunked_ref)

    print("KERNEL_OK")
</pallas_src>

<mosaic_0001>
module attributes {stable_mosaic.version = 11 : i64} {
  func.func @_cwd_kernel(%arg0: i32, %arg1: i32, %arg2: memref<8x256xf32, #tpu.memory_space<vmem>>, %arg3: memref<8x256xf32, #tpu.memory_space<vmem>>, %arg4: memref<1x8x128xf32, #tpu.memory_space<vmem>>, %arg5: memref<8x1xf32, #tpu.memory_space<vmem>>, %arg6: memref<8x1xf32, #tpu.memory_space<vmem>>, %arg7: memref<8x1xf32, #tpu.memory_space<vmem>>, %arg8: memref<8x1xf32, #tpu.memory_space<vmem>>, %arg9: memref<8x1xf32, #tpu.memory_space<vmem>>) attributes {dimension_semantics = [#tpu.dimension_semantics<parallel>, #tpu.dimension_semantics<arbitrary>], iteration_bounds = array<i64: 1, 1>, scalar_prefetch = 0 : i64, scratch_operands = 5 : i64, tpu.core_type = #tpu.core_type<tc>, window_params = [{transform_indices = @transform_0, window_bounds = array<i64: 8, 256>}, {transform_indices = @transform_1, window_bounds = array<i64: 8, 256>}, {transform_indices = @transform_2, window_bounds = array<i64: 1, 8, 128>}]} {
    %c0_i32 = arith.constant 0 : i32
    %0 = arith.cmpi eq, %arg1, %c0_i32 : i32
    %1 = arith.extui %0 : i1 to i32
    %c0_i32_0 = arith.constant 0 : i32
    %2 = arith.cmpi ne, %1, %c0_i32_0 : i32
    scf.if %2 {
      %cst_34 = arith.constant -1.000000e+30 : f32
      %50 = vector.broadcast %cst_34 : f32 to vector<8x1xf32>
      %c0_35 = arith.constant 0 : index
      %c0_36 = arith.constant 0 : index
      %51 = vector.load %arg5[%c0_35, %c0_36] : memref<8x1xf32, #tpu.memory_space<vmem>>, vector<8x1xf32>
      tpu.vector_store %arg5[%c0_35, %c0_36], %50 {strides = array<i32>} : memref<8x1xf32, #tpu.memory_space<vmem>>, vector<8x1xf32>,
      %cst_37 = arith.constant -1.000000e+30 : f32
      %52 = vector.broadcast %cst_37 : f32 to vector<8x1xf32>
      %c0_38 = arith.constant 0 : index
      %c0_39 = arith.constant 0 : index
      %53 = vector.load %arg8[%c0_38, %c0_39] : memref<8x1xf32, #tpu.memory_space<vmem>>, vector<8x1xf32>
      tpu.vector_store %arg8[%c0_38, %c0_39], %52 {strides = array<i32>} : memref<8x1xf32, #tpu.memory_space<vmem>>, vector<8x1xf32>,
      %cst_40 = arith.constant 0.000000e+00 : f32
      %54 = vector.broadcast %cst_40 : f32 to vector<8x1xf32>
      %c0_41 = arith.constant 0 : index
      %c0_42 = arith.constant 0 : index
      %55 = vector.load %arg6[%c0_41, %c0_42] : memref<8x1xf32, #tpu.memory_space<vmem>>, vector<8x1xf32>
      tpu.vector_store %arg6[%c0_41, %c0_42], %54 {strides = array<i32>} : memref<8x1xf32, #tpu.memory_space<vmem>>, vector<8x1xf32>,
      %cst_43 = arith.constant 0.000000e+00 : f32
      %56 = vector.broadcast %cst_43 : f32 to vector<8x1xf32>
      %c0_44 = arith.constant 0 : index
      %c0_45 = arith.constant 0 : index
      %57 = vector.load %arg9[%c0_44, %c0_45] : memref<8x1xf32, #tpu.memory_space<vmem>>, vector<8x1xf32>
      tpu.vector_store %arg9[%c0_44, %c0_45], %56 {strides = array<i32>} : memref<8x1xf32, #tpu.memory_space<vmem>>, vector<8x1xf32>,
      %cst_46 = arith.constant 0.000000e+00 : f32
      %58 = vector.broadcast %cst_46 : f32 to vector<8x1xf32>
      %c0_47 = arith.constant 0 : index
      %c0_48 = arith.constant 0 : index
      %59 = vector.load %arg7[%c0_47, %c0_48] : memref<8x1xf32, #tpu.memory_space<vmem>>, vector<8x1xf32>
      tpu.vector_store %arg7[%c0_47, %c0_48], %58 {strides = array<i32>} : memref<8x1xf32, #tpu.memory_space<vmem>>, vector<8x1xf32>,
    } else {
    }
    %c0 = arith.constant 0 : index
    %c0_1 = arith.constant 0 : index
    %3 = vector.load %arg2[%c0, %c0_1] : memref<8x256xf32, #tpu.memory_space<vmem>>, vector<8x256xf32>
    %c0_2 = arith.constant 0 : index
    %c0_3 = arith.constant 0 : index
    %4 = vector.load %arg3[%c0_2, %c0_3] : memref<8x256xf32, #tpu.memory_space<vmem>>, vector<8x256xf32>
    %5 = arith.subf %3, %4 : vector<8x256xf32>
    %c0_4 = arith.constant 0 : index
    %c0_5 = arith.constant 0 : index
    %6 = vector.load %arg5[%c0_4, %c0_5] : memref<8x1xf32, #tpu.memory_space<vmem>>, vector<8x1xf32>
    %cst = arith.constant dense<0xFF800000> : vector<8xf32>
    %7 = vector.multi_reduction <maximumf>, %3, %cst [1] : vector<8x256xf32> to vector<8xf32>
    %8 = vector.shape_cast %7 : vector<8xf32> to vector<8x1xf32>
    %9 = arith.maximumf %6, %8 : vector<8x1xf32>
    %c0_6 = arith.constant 0 : index
    %c0_7 = arith.constant 0 : index
    %10 = vector.load %arg5[%c0_6, %c0_7] : memref<8x1xf32, #tpu.memory_space<vmem>>, vector<8x1xf32>
    %11 = arith.subf %10, %9 : vector<8x1xf32>
    %12 = math.exp %11 : vector<8x1xf32>
    %13 = vector.broadcast %9 : vector<8x1xf32> to vector<8x256xf32>
    %14 = arith.subf %3, %13 : vector<8x256xf32>
    %15 = math.exp %14 : vector<8x256xf32>
    %c0_8 = arith.constant 0 : index
    %c0_9 = arith.constant 0 : index
    %16 = vector.load %arg6[%c0_8, %c0_9] : memref<8x1xf32, #tpu.memory_space<vmem>>, vector<8x1xf32>
    %17 = arith.mulf %12, %16 : vector<8x1xf32>
    %cst_10 = arith.constant dense<0.000000e+00> : vector<8xf32>
    %18 = vector.multi_reduction <add>, %15, %cst_10 [1] : vector<8x256xf32> to vector<8xf32>
    %19 = vector.shape_cast %18 : vector<8xf32> to vector<8x1xf32>
    %20 = arith.addf %17, %19 : vector<8x1xf32>
    %c0_11 = arith.constant 0 : index
    %c0_12 = arith.constant 0 : index
    %21 = vector.load %arg6[%c0_11, %c0_12] : memref<8x1xf32, #tpu.memory_space<vmem>>, vector<8x1xf32>
    tpu.vector_store %arg6[%c0_11, %c0_12], %20 {strides = array<i32>} : memref<8x1xf32, #tpu.memory_space<vmem>>, vector<8x1xf32>,
    %c0_13 = arith.constant 0 : index
    %c0_14 = arith.constant 0 : index
    %22 = vector.load %arg7[%c0_13, %c0_14] : memref<8x1xf32, #tpu.memory_space<vmem>>, vector<8x1xf32>
    %23 = arith.mulf %12, %22 : vector<8x1xf32>
    %24 = arith.mulf %15, %5 : vector<8x256xf32>
    %cst_15 = arith.constant dense<0.000000e+00> : vector<8xf32>
    %25 = vector.multi_reduction <add>, %24, %cst_15 [1] : vector<8x256xf32> to vector<8xf32>
    %26 = vector.shape_cast %25 : vector<8xf32> to vector<8x1xf32>
    %27 = arith.addf %23, %26 : vector<8x1xf32>
    %c0_16 = arith.constant 0 : index
    %c0_17 = arith.constant 0 : index
    %28 = vector.load %arg7[%c0_16, %c0_17] : memref<8x1xf32, #tpu.memory_space<vmem>>, vector<8x1xf32>
    tpu.vector_store %arg7[%c0_16, %c0_17], %27 {strides = array<i32>} : memref<8x1xf32, #tpu.memory_space<vmem>>, vector<8x1xf32>,
    %c0_18 = arith.constant 0 : index
    %c0_19 = arith.constant 0 : index
    %29 = vector.load %arg5[%c0_18, %c0_19] : memref<8x1xf32, #tpu.memory_space<vmem>>, vector<8x1xf32>
    tpu.vector_store %arg5[%c0_18, %c0_19], %9 {strides = array<i32>} : memref<8x1xf32, #tpu.memory_space<vmem>>, vector<8x1xf32>,
    %c0_20 = arith.constant 0 : index
    %c0_21 = arith.constant 0 : index
    %30 = vector.load %arg8[%c0_20, %c0_21] : memref<8x1xf32, #tpu.memory_space<vmem>>, vector<8x1xf32>
    %cst_22 = arith.constant dense<0xFF800000> : vector<8xf32>
    %31 = vector.multi_reduction <maximumf>, %4, %cst_22 [1] : vector<8x256xf32> to vector<8xf32>
    %32 = vector.shape_cast %31 : vector<8xf32> to vector<8x1xf32>
    %33 = arith.maximumf %30, %32 : vector<8x1xf32>
    %c0_23 = arith.constant 0 : index
    %c0_24 = arith.constant 0 : index
    %34 = vector.load %arg8[%c0_23, %c0_24] : memref<8x1xf32, #tpu.memory_space<vmem>>, vector<8x1xf32>
    %35 = arith.subf %34, %33 : vector<8x1xf32>
    %36 = math.exp %35 : vector<8x1xf32>
    %c0_25 = arith.constant 0 : index
    %c0_26 = arith.constant 0 : index
    %37 = vector.load %arg9[%c0_25, %c0_26] : memref<8x1xf32, #tpu.memory_space<vmem>>, vector<8x1xf32>
    %38 = arith.mulf %36, %37 : vector<8x1xf32>
    %39 = vector.broadcast %33 : vector<8x1xf32> to vector<8x256xf32>
    %40 = arith.subf %4, %39 : vector<8x256xf32>
    %41 = math.exp %40 : vector<8x256xf32>
    %cst_27 = arith.constant dense<0.000000e+00> : vector<8xf32>
    %42 = vector.multi_reduction <add>, %41, %cst_27 [1] : vector<8x256xf32> to vector<8xf32>
    %43 = vector.shape_cast %42 : vector<8xf32> to vector<8x1xf32>
    %44 = arith.addf %38, %43 : vector<8x1xf32>
    %c0_28 = arith.constant 0 : index
    %c0_29 = arith.constant 0 : index
    %45 = vector.load %arg9[%c0_28, %c0_29] : memref<8x1xf32, #tpu.memory_space<vmem>>, vector<8x1xf32>
    tpu.vector_store %arg9[%c0_28, %c0_29], %44 {strides = array<i32>} : memref<8x1xf32, #tpu.memory_space<vmem>>, vector<8x1xf32>,
    %c0_30 = arith.constant 0 : index
    %c0_31 = arith.constant 0 : index
    %46 = vector.load %arg8[%c0_30, %c0_31] : memref<8x1xf32, #tpu.memory_space<vmem>>, vector<8x1xf32>
    tpu.vector_store %arg8[%c0_30, %c0_31], %33 {strides = array<i32>} : memref<8x1xf32, #tpu.memory_space<vmem>>, vector<8x1xf32>,
    %c0_i32_32 = arith.constant 0 : i32
    %47 = arith.cmpi eq, %arg1, %c0_i32_32 : i32
    %48 = arith.extui %47 : i1 to i32
    %c0_i32_33 = arith.constant 0 : i32
    %49 = arith.cmpi ne, %48, %c0_i32_33 : i32
    scf.if %49 {
      %c0_34 = arith.constant 0 : index
      %c0_35 = arith.constant 0 : index
      %50 = vector.load %arg7[%c0_34, %c0_35] : memref<8x1xf32, #tpu.memory_space<vmem>>, vector<8x1xf32>
      %c0_36 = arith.constant 0 : index
      %c0_37 = arith.constant 0 : index
      %51 = vector.load %arg6[%c0_36, %c0_37] : memref<8x1xf32, #tpu.memory_space<vmem>>, vector<8x1xf32>
      %52 = tpu.reciprocal %51 : vector<8x1xf32> -> vector<8x1xf32>
      %53 = arith.mulf %50, %52 : vector<8x1xf32>
      %c0_38 = arith.constant 0 : index
      %c0_39 = arith.constant 0 : index
      %54 = vector.load %arg8[%c0_38, %c0_39] : memref<8x1xf32, #tpu.memory_space<vmem>>, vector<8x1xf32>
      %c0_40 = arith.constant 0 : index
      %c0_41 = arith.constant 0 : index
      %55 = vector.load %arg5[%c0_40, %c0_41] : memref<8x1xf32, #tpu.memory_space<vmem>>, vector<8x1xf32>
      %56 = arith.subf %54, %55 : vector<8x1xf32>
      %57 = arith.addf %53, %56 : vector<8x1xf32>
      %c0_42 = arith.constant 0 : index
      %c0_43 = arith.constant 0 : index
      %58 = vector.load %arg9[%c0_42, %c0_43] : memref<8x1xf32, #tpu.memory_space<vmem>>, vector<8x1xf32>
      %59 = math.log %58 : vector<8x1xf32>
      %60 = arith.addf %57, %59 : vector<8x1xf32>
      %c0_44 = arith.constant 0 : index
      %c0_45 = arith.constant 0 : index
      %61 = vector.load %arg6[%c0_44, %c0_45] : memref<8x1xf32, #tpu.memory_space<vmem>>, vector<8x1xf32>
      %62 = math.log %61 : vector<8x1xf32>
      %63 = arith.subf %60, %62 : vector<8x1xf32>
      %64 = vector.shape_cast %63 : vector<8x1xf32> to vector<1x8x1xf32>
      %cst_46 = arith.constant dense<0.000000e+00> : vector<1xf32>
      %65 = vector.multi_reduction <add>, %64, %cst_46 [1, 2] : vector<1x8x1xf32> to vector<1xf32>
      %66 = vector.shape_cast %65 : vector<1xf32> to vector<1x1x1xf32>
      %67 = vector.extract %66[0, 0, 0] : f32 from vector<1x1x1xf32>
      %68 = tpu.iota {dimensions = array<i32: 1>} : vector<1x8x128xi32>
      %c128_i32 = arith.constant 128 : i32
      %69 = vector.broadcast %c128_i32 : i32 to vector<1x8x128xi32>
      %70 = arith.muli %68, %69 : vector<1x8x128xi32>
      %71 = tpu.iota {dimensions = array<i32: 2>} : vector<1x8x128xi32>
      %72 = arith.addi %70, %71 : vector<1x8x128xi32>
      %c0_i32_47 = arith.constant 0 : i32
      %73 = vector.broadcast %c0_i32_47 : i32 to vector<1x8x128xi32>
      %74 = arith.cmpi eq, %72, %73 : vector<1x8x128xi32>
      %cst_48 = arith.constant 0.000000e+00 : f32
      %75 = vector.broadcast %67 : f32 to vector<1x8x128xf32>
      %76 = vector.broadcast %cst_48 : f32 to vector<1x8x128xf32>
      %77 = arith.select %74, %75, %76 : vector<1x8x128xi1>, vector<1x8x128xf32>
      %c0_49 = arith.constant 0 : index
      %c0_50 = arith.constant 0 : index
      %c0_51 = arith.constant 0 : index
      %78 = vector.load %arg4[%c0_49, %c0_50, %c0_51] : memref<1x8x128xf32, #tpu.memory_space<vmem>>, vector<1x8x128xf32>
      tpu.vector_store %arg4[%c0_49, %c0_50, %c0_51], %77 {strides = array<i32>} : memref<1x8x128xf32, #tpu.memory_space<vmem>>, vector<1x8x128xf32>,
    } else {
    }
    return
  }
  func.func @transform_0(%arg0: i32, %arg1: i32) -> (i32, i32) {
    %c0_i32 = arith.constant 0 : i32
    return %arg0, %arg1 : i32, i32
  }
  func.func @transform_1(%arg0: i32, %arg1: i32) -> (i32, i32) {
    %c0_i32 = arith.constant 0 : i32
    return %arg0, %arg1 : i32, i32
  }
  func.func @transform_2(%arg0: i32, %arg1: i32) -> (i32, i32, i32) {
    %c0_i32 = arith.constant 0 : i32
    %c0_i32_0 = arith.constant 0 : i32
    %c0_i32_1 = arith.constant 0 : i32
    return %arg0, %c0_i32, %c0_i32_0 : i32, i32, i32
  }
}

</mosaic_0001>

<bundles_post_ra>
// kernel: tpu_custom_call.1
= control target key start
LH: loop header
LB: loop body
LE: loop exit
PB: predicated region body
PF: predicated region fallthrough
CT: control target
= control target key end

     0   :  { %7 = vsyncpa [#allocation8], 0  ;;  %s305_s0 = inlined_call_operand.hbm [shape: f32[8,256], index: 0, kind: input, shape index: {}]   ;;  %s306_s1 = inlined_call_operand.hbm [shape: f32[8,256], index: 1, kind: input, shape index: {}]   ;;  %s307_s2 = inlined_call_operand.hbm [shape: f32[1,8,128], index: 2, kind: output, shape index: {}]  }
   0x1   :  { %8 = vsyncpa [#allocation11], 0 }
   0x2   :  { %9 = vsyncpa [#allocation9], 0  ;;  %s264_s9 = smov [#allocation7]   ;;  %s265_s11 = smov [#allocation10]  }
   0x3   :  { %s16_s10 = sshll.u32 %s264_s9, 4  ;;  %s26_s12 = sshll.u32 %s265_s11, 4  ;;  %s17_s10 = int_to_ptr.vmem [resolvable:$true] %s16_s10  ;;  %s27_s12 = int_to_ptr.vmem [resolvable:$true] %s26_s12 }
   0x4   :  { %s206_s13 = scalar_lea.vmem %s17_s10, 256  ;;  %p211_p1 = scmp.lt.s32.totalorder %s17_s10, %s17_s10 }
   0x5   :  { %p207_p0 = scmp.ne.s32.totalorder %s17_s10, %s206_s13  ;;  %p212_p2 = scmp.lt.s32.totalorder %s206_s13, %s206_s13 }
   0x7   :  { %p213_p3 = por %p212_p2, %p211_p1 }
   0x9   :  { %p214_p4 = pnand %p213_p3, %p207_p0 }
   0xb   :  { %217 = shalt.err (!%p214_p4)
}
   0xc   :  { %19 = dma.hbm_to_vmem [thread:$0]  %s305_s0, 256, %s17_s10, [#allocation8]  }
   0xd   :  { %s226_s16 = scalar_lea.vmem %s27_s12, 256  ;;  %p231_p6 = scmp.lt.s32.totalorder %s27_s12, %s27_s12 }
   0xe   :  { %p227_p5 = scmp.ne.s32.totalorder %s27_s12, %s226_s16  ;;  %p232_p7 = scmp.lt.s32.totalorder %s226_s16, %s226_s16 }
  0x10   :  { %p233_p8 = por %p232_p7, %p231_p6 }
  0x12   :  { %p234_p9 = pnand %p233_p8, %p227_p5 }
  0x14   :  { %237 = shalt.err (!%p234_p9)
}
  0x15   :  { %29 = dma.hbm_to_vmem [thread:$0]  %s306_s1, 256, %s27_s12, [#allocation11]  }
  0x16   :  { %258 = dma.done.wait [#allocation8], 256  }
  0x17   :  { %259 = vsyncadd [#allocation8], 4294967040 }
  0x18   :  { %260 = dma.done.wait [#allocation11], 256  }
  0x19   :  { %261 = vsyncadd [#allocation11], 4294967040  ;;  %vm40_vm0 = vcmask 7168   ;;  %v266_v0 = vmov -1e+30   ;;  %v46_v1 = vld [vmem:[#allocation7] sm:$0xff] }
  0x1a   :  { %41 = vst.msk [vmem:[#allocation2] sm:$0xff] %vm40_vm0, %v266_v0  ;;  %42 = vst.msk [vmem:[#allocation5] sm:$0xff] %vm40_vm0, %v266_v0  ;;  %v47_v2 = vld [vmem:[#allocation7 + $0x8] sm:$0xff]  ;;  %v48_v3 = vld [vmem:[#allocation10] sm:$0xff]  ;;  %v267_v7 = vmov 0   ;;  %v268_v8 = vmov 0.0  }
  0x1b   :  { %v53_v4 = vmax.f32 %v46_v1, %v47_v2  ;;  %v49_v5 = vld [vmem:[#allocation10 + $0x8] sm:$0xff]  ;;  %178 = vset.pattern.permute.xlu1 %v267_v7  ;;  %179 = vset.pattern.permute.xlu0 %v267_v7  ;;  %43 = vst.msk [vmem:[#allocation3] sm:$0xff] %vm40_vm0, %v268_v8  ;;  %44 = vst.msk [vmem:[#allocation6] sm:$0xff] %vm40_vm0, %v268_v8  ;;  %v50_v27 = vsub.f32 %v46_v1, %v48_v3  ;;  %s269_s0 = smov [#allocation12]  }
  0x1c   :  { %v90_v6 = vmax.f32 %v48_v3, %v49_v5  ;;  %45 = vst.msk [vmem:[#allocation4] sm:$0xff] %vm40_vm0, %v268_v8  ;;  %v51_v28 = vsub.f32 %v47_v2, %v49_v5  ;;  %s160_s1 = sshll.u32 %s269_s0, 4  ;;  %s161_s1 = int_to_ptr.vmem [resolvable:$true] %s160_s1 }
  0x1d   :  { %54 = vmax.xlane.f32.xlu0 %v53_v4  ;;  %s238_s20 = scalar_lea.vmem %s161_s1, 128  ;;  %p243_p11 = scmp.lt.s32.totalorder %s161_s1, %s161_s1 }
  0x1e   :  { %p239_p10 = scmp.ne.s32.totalorder %s161_s1, %s238_s20  ;;  %p244_p12 = scmp.lt.s32.totalorder %s238_s20, %s238_s20 }
  0x20   :  { %p245_p13 = por %p244_p12, %p243_p11 }
  0x21   :  { %91 = vmax.xlane.f32.xlu0 %v90_v6  ;;  %v52_v9 = vld [vmem:[#allocation2] sm:$0xff]  ;;  %v89_v12 = vld [vmem:[#allocation5] sm:$0xff] }
  0x22   :  { %v71_v41 = vld [vmem:[#allocation3] sm:$0xff]  ;;  %v97_v46 = vld [vmem:[#allocation6] sm:$0xff]  ;;  %p246_p0 = pnand %p245_p13, %p239_p10 }
  0x23   :  { %v79_v45 = vld [vmem:[#allocation4] sm:$0xff] }
  0xa6   :  { %v55_v10 = vpop.xlane.xlu0 %54 }
  0xa7   :  { %v56_v11 = vmax.f32 %v52_v9, %v55_v10 }
  0xa9   :  { %v57_v13 = vsub.f32 %v52_v9, %v56_v11  ;;  %88 = vst.msk [vmem:[#allocation2] sm:$0xff] %vm40_vm0, %v56_v11  ;;  %62 = vperm.xlu1 %178, %v56_v11  }
  0xaa   :  { %v92_v14 = vpop.xlane.xlu0 %91 }
  0xab   :  { %v93_v15 = vmax.f32 %v89_v12, %v92_v14  ;;  %v58_v38 = vmul.f32 1.442695, %v57_v13  ;;  %v144_v13 = vlaneseq }
  0xad   :  { %v94_v16 = vsub.f32 %v89_v12, %v93_v15  ;;  %115 = vst.msk [vmem:[#allocation5] sm:$0xff] %vm40_vm0, %v93_v15  ;;  %101 = vperm.xlu1 %178, %v93_v15   ;;  %v145_v14 = vshrl.u32 %v144_v13, 7 }
  0xaf   :  { %v95_v39 = vmul.f32 1.442695, %v94_v16  ;;  %v146_v15 = vmul.u32 128, %v145_v14  ;;  %v148_v16 = vand.u32 127, %v144_v13 }
  0xb0   :  { %v124_v60 = vld [vmem:[#allocation2] sm:$0xff] }
  0xb4   :  { %v123_v58 = vld [vmem:[#allocation5] sm:$0xff] }
  0xb5   :  { %v125_v62 = vsub.f32 %v123_v58, %v124_v60 }
 0x124   :  { %v63_v17 = vpop.permute.xlu1 %62 }
 0x125   :  { %v65_v18 = vsub.f32 %v46_v1, %v63_v17  ;;  %v66_v19 = vsub.f32 %v47_v2, %v63_v17  ;;  %v149_v17 = vadd.s32 %v148_v16, %v146_v15 }
 0x127   :  { %v67_v20 = vmul.f32 1.442695, %v65_v18  ;;  %v69_v21 = vmul.f32 1.442695, %v66_v19  ;;  %vm150_vm1 = vcmp.eq.s32.totalorder %v149_v17, 0 }
 0x128   :  { %v102_v22 = vpop.permute.xlu1 %101 }
 0x129   :  { %180 = vpow2.f32 %v67_v20  ;;  %v104_v23 = vsub.f32 %v48_v3, %v102_v22  ;;  %v105_v24 = vsub.f32 %v49_v5, %v102_v22 }
 0x12a   :  { %182 = vpow2.f32 %v69_v21 }
 0x12b   :  { %v106_v25 = vmul.f32 1.442695, %v104_v23  ;;  %v108_v26 = vmul.f32 1.442695, %v105_v24 }
 0x12d   :  { %184 = vpow2.f32 %v106_v25 }
 0x12e   :  { %186 = vpow2.f32 %v108_v26 }
 0x12f   :  { %188 = vpow2.f32 %v58_v38 }
 0x130   :  { %190 = vpow2.f32 %v95_v39 }
 0x136   :  { %v181_v29 = vpop.eup %180 }
 0x137   :  { %v183_v30 = vpop.eup %182  ;;  %v81_v32 = vmul.f32 %v181_v29, %v50_v27 }
 0x138   :  { %v73_v31 = vadd.f32 %v183_v30, %v181_v29  ;;  %v82_v33 = vmul.f32 %v183_v30, %v51_v28 }
 0x13a   :  { %v185_v34 = vpop.eup %184  ;;  %74 = vadd.xlane.f32.xlu0 %v73_v31  ;;  %v83_v36 = vadd.f32 %v82_v33, %v81_v32 }
 0x13b   :  { %v187_v35 = vpop.eup %186 }
 0x13c   :  { %v110_v37 = vadd.f32 %v187_v35, %v185_v34  ;;  %v189_v40 = vpop.eup %188 }
 0x13d   :  { %v72_v42 = vmul.f32 %v189_v40, %v71_v41  ;;  %v191_v43 = vpop.eup %190  ;;  %v80_v48 = vmul.f32 %v189_v40, %v79_v45 }
 0x13e   :  { %84 = vadd.xlane.f32.xlu0 %v83_v36  ;;  %111 = vadd.xlane.f32.xlu1 %v110_v37  ;;  %v98_v49 = vmul.f32 %v191_v43, %v97_v46 }
 0x1c3   :  { %v75_v44 = vpop.xlane.xlu0 %74 }
 0x1c4   :  { %v76_v47 = vadd.f32 %v75_v44, %v72_v42 }
 0x1c6   :  { %78 = vst.msk [vmem:[#allocation3] sm:$0xff] %vm40_vm0, %v76_v47 }
 0x1c7   :  { %v85_v50 = vpop.xlane.xlu0 %84  ;;  %v112_v51 = vpop.xlane.xlu1 %111 }
 0x1c8   :  { %v86_v52 = vadd.f32 %v85_v50, %v80_v48  ;;  %v113_v53 = vadd.f32 %v112_v51, %v98_v49 }
 0x1ca   :  { %87 = vst.msk [vmem:[#allocation4] sm:$0xff] %vm40_vm0, %v86_v52  ;;  %114 = vst.msk [vmem:[#allocation6] sm:$0xff] %vm40_vm0, %v113_v53 }
 0x1cd   :  { %v120_v54 = vld [vmem:[#allocation3] sm:$0xff] }
 0x1ce   :  { %192 = vrcp.f32 %v120_v54 }
 0x1cf   :  { %194 = vlog2.f32 %v120_v54 }
 0x1d1   :  { %v127_v55 = vld [vmem:[#allocation6] sm:$0xff]  ;;  %v119_v57 = vld [vmem:[#allocation4] sm:$0xff] }
 0x1d2   :  { %196 = vlog2.f32 %v127_v55 }
 0x1db   :  { %v193_v56 = vpop.eup %192 }
 0x1dc   :  { %v122_v59 = vmul.f32 %v193_v56, %v119_v57  ;;  %v195_v61 = vpop.eup %194 }
 0x1dd   :  { %v132_v3 = vmul.f32 0.6931472, %v195_v61 }
 0x1de   :  { %v126_v0 = vadd.f32 %v125_v62, %v122_v59 }
 0x1df   :  { %v197_v63 = vpop.eup %196 }
 0x1e0   :  { %v129_v1 = vmul.f32 0.6931472, %v197_v63 }
 0x1e2   :  { %v130_v2 = vadd.f32 %v129_v1, %v126_v0 }
 0x1e4   :  { %v133_v4 = vsub.f32 %v130_v2, %v132_v3 }
 0x1e6   :  { %v134_v5 = vsel %vm40_vm0, %v133_v4, 0.0 }
 0x1e7   :  { %135 = vadd.xlane.f32.xlu0 %v134_v5 }
 0x270   :  { %v136_v6 = vpop.xlane.xlu0 %135 }
 0x271   :  { %v137_v7 = vrot.slane %v136_v6, 4 }
 0x273   :  { %v138_v8 = vadd.f32 %v137_v7, %v136_v6 }
 0x275   :  { %v139_v9 = vrot.slane %v138_v8, 2 }
 0x277   :  { %v140_v10 = vadd.f32 %v139_v9, %v138_v8 }
 0x279   :  { %v141_v11 = vrot.slane %v140_v10, 1 }
 0x27b   :  { %v142_v12 = vadd.f32 %v141_v11, %v140_v10 }
 0x27d   :  { %170 = vpush %v142_v12 }
 0x2ae   :  { %s171_s19 = spop %170 }
 0x2af   :  { %v151_v18 = vstv %s171_s19 }
 0x2b0   :  { %v152_v19 = vsel %vm150_vm1, %v151_v18, 0.0 }
 0x2b1   :  { %153 = vst [vmem:[#allocation12] sm:$0xff] %v152_v19 }
 0x2b2   :  { %249 = shalt.err (!%p246_p0)
}
 0x2b3   :  { %163 = dma.vmem_to_hbm [thread:$0]  %s161_s1, 128, %s307_s2, [#allocation9]  }
 0x2b4   :  { %262 = dma.done.wait [#allocation9], 128  }
 0x2b5   :  { %263 = vsyncadd [#allocation9], 4294967168 }
 0x2b6   :  { %167 = vsyncpa [#allocation8], 1 }
 0x2b7   :  { %168 = vsyncpa [#allocation11], 1 }
 0x2b8   :  { %169 = vsyncpa [#allocation9], 1 }

</bundles_post_ra>
